<compile_context>
chip_gen: v7x
topology: tpu7x:2x2x1
jax: 0.10.0
libtpu: 0.0.40
codegen_flags: <defaults>
</compile_context>

<pallas_src>
import functools

import jax
import jax.numpy as jnp
from jax.experimental import pallas as pl
from jax.experimental.pallas import tpu as pltpu


# -----------------------------------------------------------------------------
# helpers
# -----------------------------------------------------------------------------
def _round_up(n, m):
    return ((n + m - 1) // m) * m


def _pad_to(a, shape, dtype):
    out = jnp.zeros(shape, dtype)
    return out.at[tuple(slice(0, s) for s in a.shape)].set(a.astype(dtype))


# -----------------------------------------------------------------------------
# fused kernel: fc1 (K-tiled) -> fc2 (slot-sliced single-K contraction) -> L2 norm
# -----------------------------------------------------------------------------
def _jigsaw_fused_kernel(x_ref, w1_ref, b1_ref, w2_ref, b2_ref, o_ref, y_acc,
                         *, k, tm, do_p, compute_dtype):
    """One grid step = (one block of tm images) x (one dim_in reduction tile).

    x_ref  : VMEM (k*tm, tk)       shuffled, slot-major rows of this block / K tile
    w1_ref : VMEM (tk, do_p)       fc1 weight K tile
    b1_ref : VMEM (1, do_p)        fc1 bias      (VMEM resident)
    w2_ref : VMEM (k*do_p, do_p)   fc2 weight    (VMEM resident)
    b2_ref : VMEM (1, do_p)        fc2 bias      (VMEM resident)
    o_ref  : VMEM (tm, do_p)       normalized output block
    y_acc  : VMEM scratch (k*tm, do_p) f32; row j*tm + m = fc1 of (image m, slot j)
    """
    # Grid queries only at kernel top level (program_id inside a pl.when body was
    # the previous lowering failure).
    kk = pl.program_id(1)
    nk = pl.num_programs(1)

    @pl.when(kk == 0)
    def _init():
        # Fold the fc1 bias into the accumulator init (the init write happens
        # anyway, so the epilogue bias pass is free).
        y_acc[...] = jnp.broadcast_to(b1_ref[...], y_acc.shape).astype(jnp.float32)

    # fc1: one (k*tm, tk) @ (tk, do_p) MXU matmul per dim_in tile, f32 accumulate.
    y_acc[...] += jnp.dot(x_ref[...], w1_ref[...],
                          preferred_element_type=jnp.float32)

    @pl.when(kk == nk - 1)
    def _finalize():
        # fc2: Z @ w2 with Z = (tm, k*do_p).  Computed as the sum of k partial
        # products over contiguous (tm, do_p) sublane slices of y_acc, which is
        # mathematically identical to the single K = k*do_p matmul but needs no
        # (k*tm, do_p) -> (tm, k*do_p) VMEM relayout.  b2 folded into the init.
        acc = jnp.broadcast_to(b2_ref[...], (tm, do_p)).astype(jnp.float32)
        for j in range(k):                                   # static unroll, k = 9
            y_j = y_acc[pl.ds(j * tm, tm), :].astype(compute_dtype)
            w2_j = w2_ref[pl.ds(j * do_p, do_p), :]
            acc = acc + jnp.dot(y_j, w2_j, preferred_element_type=jnp.float32)

        # F.normalize(x, p=2, dim=1, eps=1e-12) == x * rsqrt(max(sum(x^2), eps^2))
        ssq = jnp.sum(acc * acc, axis=-1, keepdims=True)
        o_ref[...] = (acc * jax.lax.rsqrt(jnp.maximum(ssq, 1e-24))).astype(o_ref.dtype)


# -----------------------------------------------------------------------------
# JigsawHead forward (head='linear')
# -----------------------------------------------------------------------------
def jigsaw_head_forward(x, params, shuffle_ids, k,
                        compute_dtype=jnp.bfloat16, img_tile=None):
    """x: (bsz, dim_in) float32, bsz = n_img * k.  Returns (n_img, dim_out) f32."""
    x = jnp.asarray(x, jnp.float32)
    w1 = jnp.asarray(params["w1"], jnp.float32)            # (dim_in, dim_out)
    b1 = jnp.asarray(params["b1"], jnp.float32).reshape(1, -1)
    w2 = jnp.asarray(params["w2"], jnp.float32)            # (k*dim_out, dim_out)
    b2 = jnp.asarray(params["b2"], jnp.float32).reshape(1, -1)

    bsz, dim_in = x.shape
    dim_out = w1.shape[1]
    n_img = bsz // k

    # ---- MXU / lane-friendly padded sizes ------------------------------------
    do_p = _round_up(dim_out, 128)       # dim_out untiled: L2 norm sees full feature dim
    di_p = _round_up(dim_in, 128)
    tk = 128
    for cand in (512, 256, 128):         # largest reduction tile that divides di_p
        if di_p % cand == 0:
            tk = cand
            break

    if img_tile is None:
        # Big image tiles fill the MXU M dim (k*tm fc1 rows) and amortize w1
        # re-fetch / per-grid-step overhead, but keep >= 2 image blocks when
        # n_img allows so v7x's two TensorCores both get work ("parallel" axis).
        img_tile = 64
        if n_img < 2 * img_tile:
            img_tile = max(8, (n_img + 1) // 2) if n_img > 16 else max(n_img, 1)
    tm = max(16, _round_up(img_tile, 16))   # multiple of 16: bf16 sublane friendly
    n_img_p = _round_up(n_img, tm)
    n_blocks = n_img_p // tm
    rows_p = n_img_p * k

    # ---- wrapper-side shuffle + slot-major reorder of x -----------------------
    # fc1 is row-wise => (x @ w1 + b1)[shuffle_ids] == x[shuffle_ids] @ w1 + b1.
    # Apply the shuffle here (one cheap HBM gather) and lay rows out slot-major
    # per image block:   row  b*(k*tm) + j*tm + m  ==  x[shuffle_ids[(b*tm+m)*k + j]]
    sid = jnp.asarray(shuffle_ids, jnp.int32)
    sid_p = jnp.concatenate([sid, jnp.arange(bsz, rows_p, dtype=jnp.int32)])
    x_p = _pad_to(x, (rows_p, di_p), compute_dtype)
    x_reord = (jnp.take(x_p, sid_p, axis=0)
               .reshape(n_blocks, tm, k, di_p)
               .transpose(0, 2, 1, 3)
               .reshape(n_blocks * k * tm, di_p))

    w1_p = _pad_to(w1, (di_p, do_p), compute_dtype)
    b1_p = _pad_to(b1, (1, do_p), jnp.float32)
    w2_p = _pad_to(w2.reshape(k, dim_out, dim_out), (k, do_p, do_p),
                   compute_dtype).reshape(k * do_p, do_p)
    b2_p = _pad_to(b2, (1, do_p), jnp.float32)

    kernel = functools.partial(_jigsaw_fused_kernel, k=k, tm=tm, do_p=do_p,
                               compute_dtype=compute_dtype)

    out_p = pl.pallas_call(
        kernel,
        out_shape=jax.ShapeDtypeStruct((n_img_p, do_p), jnp.float32),
        grid_spec=pltpu.PrefetchScalarGridSpec(
            num_scalar_prefetch=0,
            grid=(n_blocks, di_p // tk),                 # (image blocks, dim_in tiles)
            in_specs=[
                pl.BlockSpec((k * tm, tk), lambda i, kk: (i, kk)),      # x (shuffled)
                pl.BlockSpec((tk, do_p), lambda i, kk: (kk, 0)),        # w1 K tile
                pl.BlockSpec((1, do_p), lambda i, kk: (0, 0)),          # b1 (resident)
                pl.BlockSpec((k * do_p, do_p), lambda i, kk: (0, 0)),   # w2 (resident)
                pl.BlockSpec((1, do_p), lambda i, kk: (0, 0)),          # b2 (resident)
            ],
            out_specs=pl.BlockSpec((tm, do_p), lambda i, kk: (i, 0)),
            scratch_shapes=[
                pltpu.VMEM((k * tm, do_p), jnp.float32),  # fc1 accumulator
            ],
        ),
        compiler_params=pltpu.CompilerParams(
            dimension_semantics=("parallel", "arbitrary"),
            vmem_limit_bytes=48 * 1024 * 1024,            # safe on v5e/v6e/v7x
        ),
    )(x_reord, w1_p, b1_p, w2_p, b2_p)

    return out_p[:n_img, :dim_out]


# -----------------------------------------------------------------------------
# deterministic equivalents of the module's RNG / init
# -----------------------------------------------------------------------------
def get_shuffle_ids(key, bsz, k):
    """Deterministic equivalent of JigsawHead.get_shuffle_ids."""
    n_img = bsz // k
    keys = jax.random.split(key, n_img)
    rnd = jnp.concatenate(
        [jax.random.permutation(keys[i], k) for i in range(n_img)], axis=0)
    base = (jnp.arange(bsz) // k) * k
    return (rnd + base).astype(jnp.int32)


def init_params(key, dim_in, dim_out, k):
    k1, k2, k3, k4 = jax.random.split(key, 4)
    s1 = 1.0 / jnp.sqrt(dim_in)
    s2 = 1.0 / jnp.sqrt(dim_out * k)
    return {
        "w1": jax.random.uniform(k1, (dim_in, dim_out), jnp.float32, -s1, s1),
        "b1": jax.random.uniform(k2, (1, dim_out), jnp.float32, -s1, s1),
        "w2": jax.random.uniform(k3, (dim_out * k, dim_out), jnp.float32, -s2, s2),
        "b2": jax.random.uniform(k4, (1, dim_out), jnp.float32, -s2, s2),
    }


if __name__ == "__main__":
    key = jax.random.PRNGKey(0)
    k_param, k_x, k_shuf = jax.random.split(key, 3)

    # small shapes consistent with the module: k=9 patches per image
    K = 9
    N_IMG = 2
    BSZ = N_IMG * K          # 18
    DIM_IN = 32
    DIM_OUT = 16

    params = init_params(k_param, DIM_IN, DIM_OUT, K)
    x = jax.random.normal(k_x, (BSZ, DIM_IN), dtype=jnp.float32)
    shuffle_ids = get_shuffle_ids(k_shuf, BSZ, K)

    fwd = jax.jit(functools.partial(jigsaw_head_forward, k=K))
    out = fwd(x, params, shuffle_ids)
    out = jax.block_until_ready(out)

    # pure-JAX f32 reference of the same math (highest precision matmuls)
    hp = jax.lax.Precision.HIGHEST
    ref = jnp.dot(x, params["w1"], precision=hp) + params["b1"]
    ref = ref[shuffle_ids].reshape(N_IMG, -1)
    ref = jnp.dot(ref, params["w2"], precision=hp) + params["b2"]
    ref = ref / jnp.maximum(
        jnp.sqrt(jnp.sum(ref * ref, axis=1, keepdims=True)), 1e-12)

    assert out.shape == (N_IMG, DIM_OUT)
    err = float(jnp.max(jnp.abs(out - ref)))
    # bf16 MXU operands with f32 accumulation vs. an f32 reference
    assert err < 3e-2, f"max abs error {err}"

    print("KERNEL_OK")
</pallas_src>

<mosaic_0001>
module attributes {stable_mosaic.version = 11 : i64} {
  func.func @_jigsaw_fused_kernel(%arg0: i32, %arg1: i32, %arg2: memref<144x128xbf16, #tpu.memory_space<vmem>>, %arg3: memref<128x128xbf16, #tpu.memory_space<vmem>>, %arg4: memref<1x128xf32, #tpu.memory_space<vmem>>, %arg5: memref<1152x128xbf16, #tpu.memory_space<vmem>>, %arg6: memref<1x128xf32, #tpu.memory_space<vmem>>, %arg7: memref<16x128xf32, #tpu.memory_space<vmem>>, %arg8: memref<144x128xf32, #tpu.memory_space<vmem>>) attributes {dimension_semantics = [#tpu.dimension_semantics<parallel>, #tpu.dimension_semantics<arbitrary>], iteration_bounds = array<i64: 1, 1>, scalar_prefetch = 0 : i64, scratch_operands = 1 : i64, tpu.core_type = #tpu.core_type<tc>, window_params = [{transform_indices = @transform_0, window_bounds = array<i64: 144, 128>}, {transform_indices = @transform_1, window_bounds = array<i64: 128, 128>}, {pipeline_mode = #tpu.pipeline_mode<synchronous>, transform_indices = @transform_2, window_bounds = array<i64: 1, 128>}, {pipeline_mode = #tpu.pipeline_mode<synchronous>, transform_indices = @transform_3, window_bounds = array<i64: 1152, 128>}, {pipeline_mode = #tpu.pipeline_mode<synchronous>, transform_indices = @transform_4, window_bounds = array<i64: 1, 128>}, {transform_indices = @transform_5, window_bounds = array<i64: 16, 128>}]} {
    %c0_i32 = arith.constant 0 : i32
    %0 = arith.cmpi eq, %arg1, %c0_i32 : i32
    %1 = arith.extui %0 : i1 to i32
    %c0_i32_0 = arith.constant 0 : i32
    %2 = arith.cmpi ne, %1, %c0_i32_0 : i32
    scf.if %2 {
      %c0_10 = arith.constant 0 : index
      %c0_11 = arith.constant 0 : index
      %12 = vector.load %arg4[%c0_10, %c0_11] : memref<1x128xf32, #tpu.memory_space<vmem>>, vector<1x128xf32>
      %13 = vector.shape_cast %12 : vector<1x128xf32> to vector<1x128xf32>
      %14 = vector.broadcast %13 : vector<1x128xf32> to vector<144x128xf32>
      %c0_12 = arith.constant 0 : index
      %c0_13 = arith.constant 0 : index
      %15 = vector.load %arg8[%c0_12, %c0_13] : memref<144x128xf32, #tpu.memory_space<vmem>>, vector<144x128xf32>
      tpu.vector_store %arg8[%c0_12, %c0_13], %14 {strides = array<i32>} : memref<144x128xf32, #tpu.memory_space<vmem>>, vector<144x128xf32>,
    } else {
    }
    %c0 = arith.constant 0 : index
    %c0_1 = arith.constant 0 : index
    %3 = vector.load %arg8[%c0, %c0_1] : memref<144x128xf32, #tpu.memory_space<vmem>>, vector<144x128xf32>
    %c0_2 = arith.constant 0 : index
    %c0_3 = arith.constant 0 : index
    %4 = vector.load %arg2[%c0_2, %c0_3] : memref<144x128xbf16, #tpu.memory_space<vmem>>, vector<144x128xbf16>
    %c0_4 = arith.constant 0 : index
    %c0_5 = arith.constant 0 : index
    %5 = vector.load %arg3[%c0_4, %c0_5] : memref<128x128xbf16, #tpu.memory_space<vmem>>, vector<128x128xbf16>
    %cst = arith.constant dense<0.000000e+00> : vector<144x128xf32>
    %6 = tpu.matmul %4, %5, %cst {dimension_numbers = #tpu.dot_dimension_numbers<[1], [0], [0], [1], [0, 0, 1, 1], [], []>} : vector<144x128xbf16>, vector<128x128xbf16>, vector<144x128xf32> -> vector<144x128xf32>
    %7 = arith.addf %3, %6 : vector<144x128xf32>
    %c0_6 = arith.constant 0 : index
    %c0_7 = arith.constant 0 : index
    %8 = vector.load %arg8[%c0_6, %c0_7] : memref<144x128xf32, #tpu.memory_space<vmem>>, vector<144x128xf32>
    tpu.vector_store %arg8[%c0_6, %c0_7], %7 {strides = array<i32>} : memref<144x128xf32, #tpu.memory_space<vmem>>, vector<144x128xf32>,
    %c0_i32_8 = arith.constant 0 : i32
    %9 = arith.cmpi eq, %arg1, %c0_i32_8 : i32
    %10 = arith.extui %9 : i1 to i32
    %c0_i32_9 = arith.constant 0 : i32
    %11 = arith.cmpi ne, %10, %c0_i32_9 : i32
    scf.if %11 {
      %c0_10 = arith.constant 0 : index
      %c0_11 = arith.constant 0 : index
      %12 = vector.load %arg6[%c0_10, %c0_11] : memref<1x128xf32, #tpu.memory_space<vmem>>, vector<1x128xf32>
      %13 = vector.shape_cast %12 : vector<1x128xf32> to vector<1x128xf32>
      %14 = vector.broadcast %13 : vector<1x128xf32> to vector<16x128xf32>
      %c0_12 = arith.constant 0 : index
      %c0_13 = arith.constant 0 : index
      %15 = vector.load %arg8[%c0_12, %c0_13] : memref<144x128xf32, #tpu.memory_space<vmem>>, vector<16x128xf32>
      %16 = arith.truncf %15 : vector<16x128xf32> to vector<16x128xbf16>
      %c0_14 = arith.constant 0 : index
      %c0_15 = arith.constant 0 : index
      %17 = vector.load %arg5[%c0_14, %c0_15] : memref<1152x128xbf16, #tpu.memory_space<vmem>>, vector<128x128xbf16>
      %cst_16 = arith.constant dense<0.000000e+00> : vector<16x128xf32>
      %18 = tpu.matmul %16, %17, %cst_16 {dimension_numbers = #tpu.dot_dimension_numbers<[1], [0], [0], [1], [0, 0, 1, 1], [], []>} : vector<16x128xbf16>, vector<128x128xbf16>, vector<16x128xf32> -> vector<16x128xf32>
      %19 = arith.addf %14, %18 : vector<16x128xf32>
      %c16 = arith.constant 16 : index
      %c0_17 = arith.constant 0 : index
      %20 = vector.load %arg8[%c16, %c0_17] : memref<144x128xf32, #tpu.memory_space<vmem>>, vector<16x128xf32>
      %21 = arith.truncf %20 : vector<16x128xf32> to vector<16x128xbf16>
      %c128 = arith.constant 128 : index
      %c0_18 = arith.constant 0 : index
      %22 = vector.load %arg5[%c128, %c0_18] : memref<1152x128xbf16, #tpu.memory_space<vmem>>, vector<128x128xbf16>
      %cst_19 = arith.constant dense<0.000000e+00> : vector<16x128xf32>
      %23 = tpu.matmul %21, %22, %cst_19 {dimension_numbers = #tpu.dot_dimension_numbers<[1], [0], [0], [1], [0, 0, 1, 1], [], []>} : vector<16x128xbf16>, vector<128x128xbf16>, vector<16x128xf32> -> vector<16x128xf32>
      %24 = arith.addf %19, %23 : vector<16x128xf32>
      %c32 = arith.constant 32 : index
      %c0_20 = arith.constant 0 : index
      %25 = vector.load %arg8[%c32, %c0_20] : memref<144x128xf32, #tpu.memory_space<vmem>>, vector<16x128xf32>
      %26 = arith.truncf %25 : vector<16x128xf32> to vector<16x128xbf16>
      %c256 = arith.constant 256 : index
      %c0_21 = arith.constant 0 : index
      %27 = vector.load %arg5[%c256, %c0_21] : memref<1152x128xbf16, #tpu.memory_space<vmem>>, vector<128x128xbf16>
      %cst_22 = arith.constant dense<0.000000e+00> : vector<16x128xf32>
      %28 = tpu.matmul %26, %27, %cst_22 {dimension_numbers = #tpu.dot_dimension_numbers<[1], [0], [0], [1], [0, 0, 1, 1], [], []>} : vector<16x128xbf16>, vector<128x128xbf16>, vector<16x128xf32> -> vector<16x128xf32>
      %29 = arith.addf %24, %28 : vector<16x128xf32>
      %c48 = arith.constant 48 : index
      %c0_23 = arith.constant 0 : index
      %30 = vector.load %arg8[%c48, %c0_23] : memref<144x128xf32, #tpu.memory_space<vmem>>, vector<16x128xf32>
      %31 = arith.truncf %30 : vector<16x128xf32> to vector<16x128xbf16>
      %c384 = arith.constant 384 : index
      %c0_24 = arith.constant 0 : index
      %32 = vector.load %arg5[%c384, %c0_24] : memref<1152x128xbf16, #tpu.memory_space<vmem>>, vector<128x128xbf16>
      %cst_25 = arith.constant dense<0.000000e+00> : vector<16x128xf32>
      %33 = tpu.matmul %31, %32, %cst_25 {dimension_numbers = #tpu.dot_dimension_numbers<[1], [0], [0], [1], [0, 0, 1, 1], [], []>} : vector<16x128xbf16>, vector<128x128xbf16>, vector<16x128xf32> -> vector<16x128xf32>
      %34 = arith.addf %29, %33 : vector<16x128xf32>
      %c64 = arith.constant 64 : index
      %c0_26 = arith.constant 0 : index
      %35 = vector.load %arg8[%c64, %c0_26] : memref<144x128xf32, #tpu.memory_space<vmem>>, vector<16x128xf32>
      %36 = arith.truncf %35 : vector<16x128xf32> to vector<16x128xbf16>
      %c512 = arith.constant 512 : index
      %c0_27 = arith.constant 0 : index
      %37 = vector.load %arg5[%c512, %c0_27] : memref<1152x128xbf16, #tpu.memory_space<vmem>>, vector<128x128xbf16>
      %cst_28 = arith.constant dense<0.000000e+00> : vector<16x128xf32>
      %38 = tpu.matmul %36, %37, %cst_28 {dimension_numbers = #tpu.dot_dimension_numbers<[1], [0], [0], [1], [0, 0, 1, 1], [], []>} : vector<16x128xbf16>, vector<128x128xbf16>, vector<16x128xf32> -> vector<16x128xf32>
      %39 = arith.addf %34, %38 : vector<16x128xf32>
      %c80 = arith.constant 80 : index
      %c0_29 = arith.constant 0 : index
      %40 = vector.load %arg8[%c80, %c0_29] : memref<144x128xf32, #tpu.memory_space<vmem>>, vector<16x128xf32>
      %41 = arith.truncf %40 : vector<16x128xf32> to vector<16x128xbf16>
      %c640 = arith.constant 640 : index
      %c0_30 = arith.constant 0 : index
      %42 = vector.load %arg5[%c640, %c0_30] : memref<1152x128xbf16, #tpu.memory_space<vmem>>, vector<128x128xbf16>
      %cst_31 = arith.constant dense<0.000000e+00> : vector<16x128xf32>
      %43 = tpu.matmul %41, %42, %cst_31 {dimension_numbers = #tpu.dot_dimension_numbers<[1], [0], [0], [1], [0, 0, 1, 1], [], []>} : vector<16x128xbf16>, vector<128x128xbf16>, vector<16x128xf32> -> vector<16x128xf32>
      %44 = arith.addf %39, %43 : vector<16x128xf32>
      %c96 = arith.constant 96 : index
      %c0_32 = arith.constant 0 : index
      %45 = vector.load %arg8[%c96, %c0_32] : memref<144x128xf32, #tpu.memory_space<vmem>>, vector<16x128xf32>
      %46 = arith.truncf %45 : vector<16x128xf32> to vector<16x128xbf16>
      %c768 = arith.constant 768 : index
      %c0_33 = arith.constant 0 : index
      %47 = vector.load %arg5[%c768, %c0_33] : memref<1152x128xbf16, #tpu.memory_space<vmem>>, vector<128x128xbf16>
      %cst_34 = arith.constant dense<0.000000e+00> : vector<16x128xf32>
      %48 = tpu.matmul %46, %47, %cst_34 {dimension_numbers = #tpu.dot_dimension_numbers<[1], [0], [0], [1], [0, 0, 1, 1], [], []>} : vector<16x128xbf16>, vector<128x128xbf16>, vector<16x128xf32> -> vector<16x128xf32>
      %49 = arith.addf %44, %48 : vector<16x128xf32>
      %c112 = arith.constant 112 : index
      %c0_35 = arith.constant 0 : index
      %50 = vector.load %arg8[%c112, %c0_35] : memref<144x128xf32, #tpu.memory_space<vmem>>, vector<16x128xf32>
      %51 = arith.truncf %50 : vector<16x128xf32> to vector<16x128xbf16>
      %c896 = arith.constant 896 : index
      %c0_36 = arith.constant 0 : index
      %52 = vector.load %arg5[%c896, %c0_36] : memref<1152x128xbf16, #tpu.memory_space<vmem>>, vector<128x128xbf16>
      %cst_37 = arith.constant dense<0.000000e+00> : vector<16x128xf32>
      %53 = tpu.matmul %51, %52, %cst_37 {dimension_numbers = #tpu.dot_dimension_numbers<[1], [0], [0], [1], [0, 0, 1, 1], [], []>} : vector<16x128xbf16>, vector<128x128xbf16>, vector<16x128xf32> -> vector<16x128xf32>
      %54 = arith.addf %49, %53 : vector<16x128xf32>
      %c128_38 = arith.constant 128 : index
      %c0_39 = arith.constant 0 : index
      %55 = vector.load %arg8[%c128_38, %c0_39] : memref<144x128xf32, #tpu.memory_space<vmem>>, vector<16x128xf32>
      %56 = arith.truncf %55 : vector<16x128xf32> to vector<16x128xbf16>
      %c1024 = arith.constant 1024 : index
      %c0_40 = arith.constant 0 : index
      %57 = vector.load %arg5[%c1024, %c0_40] : memref<1152x128xbf16, #tpu.memory_space<vmem>>, vector<128x128xbf16>
      %cst_41 = arith.constant dense<0.000000e+00> : vector<16x128xf32>
      %58 = tpu.matmul %56, %57, %cst_41 {dimension_numbers = #tpu.dot_dimension_numbers<[1], [0], [0], [1], [0, 0, 1, 1], [], []>} : vector<16x128xbf16>, vector<128x128xbf16>, vector<16x128xf32> -> vector<16x128xf32>
      %59 = arith.addf %54, %58 : vector<16x128xf32>
      %60 = arith.mulf %59, %59 : vector<16x128xf32>
      %cst_42 = arith.constant dense<0.000000e+00> : vector<16xf32>
      %61 = vector.multi_reduction <add>, %60, %cst_42 [1] : vector<16x128xf32> to vector<16xf32>
      %62 = vector.shape_cast %61 : vector<16xf32> to vector<16x1xf32>
      %cst_43 = arith.constant 1.000000e-24 : f32
      %63 = vector.broadcast %cst_43 : f32 to vector<16x1xf32>
      %64 = arith.maximumf %62, %63 : vector<16x1xf32>
      %65 = math.rsqrt %64 : vector<16x1xf32>
      %66 = vector.broadcast %65 : vector<16x1xf32> to vector<16x128xf32>
      %67 = arith.mulf %59, %66 : vector<16x128xf32>
      %c0_44 = arith.constant 0 : index
      %c0_45 = arith.constant 0 : index
      %68 = vector.load %arg7[%c0_44, %c0_45] : memref<16x128xf32, #tpu.memory_space<vmem>>, vector<16x128xf32>
      tpu.vector_store %arg7[%c0_44, %c0_45], %67 {strides = array<i32>} : memref<16x128xf32, #tpu.memory_space<vmem>>, vector<16x128xf32>,
    } else {
    }
    return
  }
  func.func @transform_0(%arg0: i32, %arg1: i32) -> (i32, i32) {
    %c0_i32 = arith.constant 0 : i32
    return %arg0, %arg1 : i32, i32
  }
  func.func @transform_1(%arg0: i32, %arg1: i32) -> (i32, i32) {
    %c0_i32 = arith.constant 0 : i32
    %c0_i32_0 = arith.constant 0 : i32
    return %arg1, %c0_i32 : i32, i32
  }
  func.func @transform_2(%arg0: i32, %arg1: i32) -> (i32, i32) {
    %c0_i32 = arith.constant 0 : i32
    %c0_i32_0 = arith.constant 0 : i32
    %c0_i32_1 = arith.constant 0 : i32
    return %c0_i32, %c0_i32_0 : i32, i32
  }
  func.func @transform_3(%arg0: i32, %arg1: i32) -> (i32, i32) {
    %c0_i32 = arith.constant 0 : i32
    %c0_i32_0 = arith.constant 0 : i32
    %c0_i32_1 = arith.constant 0 : i32
    return %c0_i32, %c0_i32_0 : i32, i32
  }
  func.func @transform_4(%arg0: i32, %arg1: i32) -> (i32, i32) {
    %c0_i32 = arith.constant 0 : i32
    %c0_i32_0 = arith.constant 0 : i32
    %c0_i32_1 = arith.constant 0 : i32
    return %c0_i32, %c0_i32_0 : i32, i32
  }
  func.func @transform_5(%arg0: i32, %arg1: i32) -> (i32, i32) {
    %c0_i32 = arith.constant 0 : i32
    %c0_i32_0 = arith.constant 0 : i32
    return %arg0, %c0_i32 : i32, i32
  }
}

</mosaic_0001>

<bundles_post_ra>
// kernel: jigsaw_head_forward.1
= control target key start
LH: loop header
LB: loop body
LE: loop exit
PB: predicated region body
PF: predicated region fallthrough
CT: control target
= control target key end

     0   :  { %v1911_v0 = vmov 0.0   ;;  %vm1912_vm0 = vmmov 0   ;;  %s2409_s1 = inlined_call_operand.vmem [shape: bf16[128,128], index: 1, kind: input, shape index: {}]   ;;  %s2410_s0 = inlined_call_operand.vmem [shape: bf16[144,128], index: 0, kind: input, shape index: {}]   ;;  %s2411_s3 = inlined_call_operand.vmem [shape: bf16[1152,128], index: 3, kind: input, shape index: {}]   ;;  %s2412_s2 = inlined_call_operand.vmem [shape: f32[1,128], index: 2, kind: input, shape index: {}]   ;;  %s2413_s4 = inlined_call_operand.vmem [shape: f32[1,128], index: 4, kind: input, shape index: {}]   ;;  %s2414_s5 = inlined_call_operand.vmem [shape: f32[16,128], index: 5, kind: output, shape index: {}]  }
   0x1   :  { %1552 = vmatprep.subr.bf16.mxu0 %v1911_v0  ;;  %v1818_v1 = vld [vmem:[%s2409_s1] sm:$0xff]   ;;  %1568 = vmatprep.mubr.msk.bf16.mxu0 %vm1912_vm0, %v1911_v0  ;;  %v1819_v2 = vld [vmem:[%s2409_s1 + $0x8] sm:$0xff]   ;;  %v1820_v3 = vld [vmem:[%s2409_s1 + $0x10] sm:$0xff]  }
   0x2   :  { %1664 = vmatprep.subr.bf16.mxu1 %v1911_v0  ;;  %1680 = vmatprep.mubr.msk.bf16.mxu1 %vm1912_vm0, %v1911_v0  ;;  %v1821_v4 = vld [vmem:[%s2409_s1 + $0x18] sm:$0xff]   ;;  %v1822_v5 = vld [vmem:[%s2409_s1 + $0x20] sm:$0xff]   ;;  %v1823_v6 = vld [vmem:[%s2409_s1 + $0x28] sm:$0xff]  }
   0x3   :  { %1553 = vmatpush3.bf16.msra.mxu0 %v1818_v1  ;;  %v1824_v7 = vld [vmem:[%s2409_s1 + $0x30] sm:$0xff]   ;;  %v1842_v8 = vld [vmem:[%s2411_s3 + $0xc0] sm:$0xff]   ;;  %v1825_v9 = vld [vmem:[%s2409_s1 + $0x38] sm:$0xff]  }
   0x4   :  { %1554 = vmatprep.subr.bf16.mxu0 %v1911_v0  ;;  %1665 = vmatpush3.bf16.msra.mxu1 %v1842_v8  ;;  %v1826_v10 = vld [vmem:[%s2410_s0] sm:$0xff]   ;;  %v1836_v12 = vld [vmem:[%s2411_s3 + $0x8] sm:$0xff]   ;;  %v1837_v14 = vld [vmem:[%s2411_s3 + $0x10] sm:$0xff]  }
   0x5   :  { %1666 = vmatprep.subr.bf16.mxu1 %v1911_v0  ;;  %v1835_v11 = vld [vmem:[%s2411_s3] sm:$0xff]   ;;  %v1827_v13 = vld [vmem:[%s2410_s0 + $0x8] sm:$0xff]   ;;  %v1838_v15 = vld [vmem:[%s2411_s3 + $0x18] sm:$0xff]  }
   0x6   :  { %v1828_v16 = vld [vmem:[%s2410_s0 + $0x10] sm:$0xff]   ;;  %v1839_v17 = vld [vmem:[%s2411_s3 + $0x20] sm:$0xff]   ;;  %v1840_v18 = vld [vmem:[%s2411_s3 + $0x28] sm:$0xff]  }
   0x7   :  { %1555 = vmatpush3.bf16.msra.mxu0 %v1819_v2  ;;  %v1829_v19 = vld [vmem:[%s2410_s0 + $0x18] sm:$0xff]   ;;  %v1841_v20 = vld [vmem:[%s2411_s3 + $0x30] sm:$0xff]   ;;  %v1830_v21 = vld [vmem:[%s2410_s0 + $0x20] sm:$0xff]  }
   0x8   :  { %1556 = vmatprep.subr.bf16.mxu0 %v1911_v0  ;;  %v1831_v22 = vld [vmem:[%s2410_s0 + $0x28] sm:$0xff]   ;;  %v1832_v23 = vld [vmem:[%s2410_s0 + $0x30] sm:$0xff]   ;;  %v1833_v24 = vld [vmem:[%s2410_s0 + $0x38] sm:$0xff]  }
   0x9   :  { %v1834_v25 = vld [vmem:[%s2410_s0 + $0x40] sm:$0xff]   ;;  %v1843_v26 = vld [vmem:[%s2411_s3 + $0x38] sm:$0xff]   ;;  %v1844_v27 = vld [vmem:[%s2411_s3 + $0xc8] sm:$0xff]  }
   0xa   :  { %1667 = vmatpush3.bf16.msra.mxu1 %v1844_v27  ;;  %v1846_v28 = vld [vmem:[%s2411_s3 + $0xd0] sm:$0xff]   ;;  %v1848_v29 = vld [vmem:[%s2411_s3 + $0xd8] sm:$0xff]   ;;  %v1850_v30 = vld [vmem:[%s2411_s3 + $0xe0] sm:$0xff]  }
   0xb   :  { %1557 = vmatpush3.bf16.msra.mxu0 %v1820_v3  ;;  %1668 = vmatprep.subr.bf16.mxu1 %v1911_v0  ;;  %v1852_v31 = vld [vmem:[%s2411_s3 + $0xe8] sm:$0xff]   ;;  %v1854_v32 = vld [vmem:[%s2411_s3 + $0xf0] sm:$0xff]   ;;  %v1856_v33 = vld [vmem:[%s2411_s3 + $0xf8] sm:$0xff]  }
   0xc   :  { %1558 = vmatprep.subr.bf16.mxu0 %v1911_v0  ;;  %v2093_v34 = vld [vmem:[%s2412_s2] ss:$0 sm:$0xff]  ;;  %v1847_v44 = vld [vmem:[%s2411_s3 + $0x48] sm:$0xff]   ;;  %v1849_v50 = vld [vmem:[%s2411_s3 + $0x50] sm:$0xff]  }
   0xd   :  { %v1845_v41 = vld [vmem:[%s2411_s3 + $0x40] sm:$0xff]   ;;  %v1851_v53 = vld [vmem:[%s2411_s3 + $0x58] sm:$0xff]   ;;  %v1855_v62 = vld [vmem:[%s2411_s3 + $0x68] sm:$0xff]  }
   0xe   :  { %1669 = vmatpush3.bf16.msra.mxu1 %v1846_v28  ;;  %v1853_v59 = vld [vmem:[%s2411_s3 + $0x60] sm:$0xff]   ;;  %v1859_v8 = vld [vmem:[%s2411_s3 + $0x78] sm:$0xff]   ;;  %v1865_v27 = vld [vmem:[%s2411_s3 + $0x90] sm:$0xff]  }
   0xf   :  { %1559 = vmatpush3.bf16.msra.mxu0 %v1821_v4  ;;  %1670 = vmatprep.subr.bf16.mxu1 %v1911_v0  ;;  %v1866_v28 = vld [vmem:[%s2411_s3 + $0x120] sm:$0xff]  }
  0x10   :  { %1560 = vmatprep.subr.bf16.mxu0 %v1911_v0 }
  0x12   :  { %1671 = vmatpush3.bf16.msra.mxu1 %v1848_v29 }
  0x13   :  { %1561 = vmatpush3.bf16.msra.mxu0 %v1822_v5  ;;  %1672 = vmatprep.subr.bf16.mxu1 %v1911_v0  ;;  %v1857_v5 = vld [vmem:[%s2411_s3 + $0x70] sm:$0xff]  }
  0x14   :  { %1562 = vmatprep.subr.bf16.mxu0 %v1911_v0 }
  0x16   :  { %1673 = vmatpush3.bf16.msra.mxu1 %v1850_v30  ;;  %v1867_v30 = vld [vmem:[%s2411_s3 + $0x98] sm:$0xff]  }
  0x17   :  { %1563 = vmatpush3.bf16.msra.mxu0 %v1823_v6  ;;  %1674 = vmatprep.subr.bf16.mxu1 %v1911_v0  ;;  %v1858_v6 = vld [vmem:[%s2411_s3 + $0x100] sm:$0xff]  }
  0x18   :  { %1564 = vmatprep.subr.bf16.mxu0 %v1911_v0 }
  0x1a   :  { %1675 = vmatpush3.bf16.msra.mxu1 %v1852_v31  ;;  %v1868_v31 = vld [vmem:[%s2411_s3 + $0x128] sm:$0xff]  }
  0x1b   :  { %1565 = vmatpush3.bf16.msra.mxu0 %v1824_v7  ;;  %1676 = vmatprep.subr.bf16.mxu1 %v1911_v0 }
  0x1c   :  { %1566 = vmatprep.subr.bf16.mxu0 %v1911_v0 }
  0x1e   :  { %1677 = vmatpush3.bf16.msra.mxu1 %v1854_v32 }
  0x1f   :  { %1567 = vmatpush3.bf16.msra.mxu0 %v1825_v9  ;;  %1678 = vmatprep.subr.bf16.mxu1 %v1911_v0  ;;  %v1860_v9 = vld [vmem:[%s2411_s3 + $0x108] sm:$0xff]  }
  0x20   :  { %1604 = vmatprep.subr.bf16.mxu0 %v1911_v0 }
  0x22   :  { %1569 = vmatmul.mubr.bf16.vlgmr.msra.gmra.mrb[0].mxu0 %v1826_v10  ;;  %1679 = vmatpush3.bf16.msra.mxu1 %v1856_v33 }
  0x23   :  { %1572 = vmatprep.mubr.msk.bf16.mxu0 %vm1912_vm0, %v1911_v0  ;;  %1605 = vmatpush3.bf16.msra.mxu0 %v1835_v11 }
  0x24   :  { %1606 = vmatprep.subr.bf16.mxu0 %v1911_v0  ;;  %1684 = vmatprep.subr.bf16.mxu1 %v1911_v0 }
  0x27   :  { %1607 = vmatpush3.bf16.msra.mxu0 %v1836_v12 }
  0x28   :  { %1608 = vmatprep.subr.bf16.mxu0 %v1911_v0 }
  0x2a   :  { %1573 = vmatmul.mubr.bf16.gmra.mrb[4].mxu0 %v1827_v13 }
  0x2b   :  { %1576 = vmatprep.mubr.msk.bf16.mxu0 %vm1912_vm0, %v1911_v0  ;;  %1609 = vmatpush3.bf16.msra.mxu0 %v1837_v14 }
  0x2c   :  { %1610 = vmatprep.subr.bf16.mxu0 %v1911_v0 }
  0x2f   :  { %1611 = vmatpush3.bf16.msra.mxu0 %v1838_v15 }
  0x30   :  { %1612 = vmatprep.subr.bf16.mxu0 %v1911_v0 }
  0x32   :  { %1577 = vmatmul.mubr.bf16.gmra.mrb[8].mxu0 %v1828_v16  ;;  %v1861_v16 = vld [vmem:[%s2411_s3 + $0x80] sm:$0xff]  }
  0x33   :  { %1580 = vmatprep.mubr.msk.bf16.mxu0 %vm1912_vm0, %v1911_v0  ;;  %1613 = vmatpush3.bf16.msra.mxu0 %v1839_v17  ;;  %v1862_v17 = vld [vmem:[%s2411_s3 + $0x110] sm:$0xff]  }
  0x34   :  { %1614 = vmatprep.subr.bf16.mxu0 %v1911_v0 }
  0x37   :  { %1615 = vmatpush3.bf16.msra.mxu0 %v1840_v18 }
  0x38   :  { %1616 = vmatprep.subr.bf16.mxu0 %v1911_v0 }
  0x3a   :  { %1581 = vmatmul.mubr.bf16.gmra.mrb[12].mxu0 %v1829_v19  ;;  %v1863_v19 = vld [vmem:[%s2411_s3 + $0x88] sm:$0xff]  }
  0x3b   :  { %1584 = vmatprep.mubr.msk.bf16.mxu0 %vm1912_vm0, %v1911_v0  ;;  %1617 = vmatpush3.bf16.msra.mxu0 %v1841_v20  ;;  %v1864_v20 = vld [vmem:[%s2411_s3 + $0x118] sm:$0xff]  }
  0x3c   :  { %1618 = vmatprep.subr.bf16.mxu0 %v1911_v0 }
  0x3f   :  { %1619 = vmatpush3.bf16.msra.mxu0 %v1843_v26 }
  0x40   :  { %1624 = vmatprep.subr.bf16.mxu0 %v1911_v0 }
  0x42   :  { %1585 = vmatmul.mubr.bf16.gmra.mrb[16].mxu0 %v1830_v21 }
  0x43   :  { %1588 = vmatprep.mubr.msk.bf16.mxu0 %vm1912_vm0, %v1911_v0 }
  0x4a   :  { %1589 = vmatmul.mubr.bf16.gmra.mrb[20].mxu0 %v1831_v22 }
  0x4b   :  { %1592 = vmatprep.mubr.msk.bf16.mxu0 %vm1912_vm0, %v1911_v0 }
  0x52   :  { %1593 = vmatmul.mubr.bf16.gmra.mrb[24].mxu0 %v1832_v23 }
  0x53   :  { %1596 = vmatprep.mubr.msk.bf16.mxu0 %vm1912_vm0, %v1911_v0 }
  0x5a   :  { %1597 = vmatmul.mubr.bf16.gmra.mrb[28].mxu0 %v1833_v24 }
  0x5b   :  { %1600 = vmatprep.mubr.msk.bf16.mxu0 %vm1912_vm0, %v1911_v0 }
  0x62   :  { %1601 = vmatmul.mubr.bf16.gmra.mrb[32].mxu0 %v1834_v25 }
  0x63   :  { %1620 = vmatprep.mubr.msk.bf16.mxu0 %vm1912_vm0, %v1911_v0 }
  0xf5   :  { %v238_v35 = vpop.f32.mrb[0].mxu0 }
  0xf6   :  { %v1570_v36 = vpop.f32.mrb[1].mxu0  ;;  %v309_v38 = vadd.f32 %v2093_v34, %v238_v35 }
  0xf7   :  { %v241_v37 = vpop.f32.mrb[2].mxu0 }
  0xf8   :  { %v310_v39 = vadd.f32 %v2093_v34, %v241_v37  ;;  %v1571_v40 = vpop.f32.mrb[3].mxu0 }
  0xf9   :  { %v1870_v40 = vld [vmem:[%s2411_s3 + $0x130] sm:$0xff]  }
  0xfa   :  { %v357_v42 = vpack.c.bf16 %v310_v39, %v309_v38  ;;  %v1869_v39 = vld [vmem:[%s2411_s3 + $0xa0] sm:$0xff]  }
  0xfc   :  { %1621 = vmatmul.mubr.bf16.vlgmr.msra.gmra.mrb[36].mxu0 %v357_v42  ;;  %v1871_v42 = vld [vmem:[%s2411_s3 + $0xa8] sm:$0xff]  }
  0xfd   :  { %1625 = vmatpush3.bf16.msra.mxu0 %v1845_v41  ;;  %v246_v43 = vpop.f32.mrb[4].mxu0  ;;  %1640 = vmatprep.mubr.msk.bf16.mxu0 %vm1912_vm0, %v1911_v0 }
  0xfe   :  { %v1574_v45 = vpop.f32.mrb[5].mxu0  ;;  %1626 = vmatprep.subr.bf16.mxu0 %v1911_v0  ;;  %v311_v47 = vadd.f32 %v2093_v34, %v246_v43  ;;  %v1872_v43 = vld [vmem:[%s2411_s3 + $0x138] sm:$0xff]  }
  0xff   :  { %v249_v46 = vpop.f32.mrb[6].mxu0 }
 0x100   :  { %v312_v48 = vadd.f32 %v2093_v34, %v249_v46  ;;  %v1575_v49 = vpop.f32.mrb[7].mxu0 }
 0x101   :  { %1627 = vmatpush3.bf16.msra.mxu0 %v1847_v44 }
 0x102   :  { %v467_v51 = vpack.c.bf16 %v312_v48, %v311_v47  ;;  %1628 = vmatprep.subr.bf16.mxu0 %v1911_v0 }
 0x105   :  { %1629 = vmatpush3.bf16.msra.mxu0 %v1849_v50  ;;  %v254_v52 = vpop.f32.mrb[8].mxu0  ;;  %v1873_v50 = vld [vmem:[%s2411_s3 + $0xb0] sm:$0xff]  }
 0x106   :  { %v1578_v54 = vpop.f32.mrb[9].mxu0  ;;  %1630 = vmatprep.subr.bf16.mxu0 %v1911_v0  ;;  %v2117_v56 = vadd.f32 %v2093_v34, %v254_v52 }
 0x107   :  { %v257_v55 = vpop.f32.mrb[10].mxu0  ;;  %v1876_v54 = vld [vmem:[%s2411_s3 + $0x148] sm:$0xff]  }
 0x108   :  { %v2120_v57 = vadd.f32 %v2093_v34, %v257_v55  ;;  %v1579_v58 = vpop.f32.mrb[11].mxu0 }
 0x109   :  { %1631 = vmatpush3.bf16.msra.mxu0 %v1851_v53  ;;  %v1875_v53 = vld [vmem:[%s2411_s3 + $0xb8] sm:$0xff]  }
 0x10a   :  { %v577_v60 = vpack.c.bf16 %v2120_v57, %v2117_v56  ;;  %1632 = vmatprep.subr.bf16.mxu0 %v1911_v0  ;;  %v1880_v56 = vld [vmem:[%s2411_s3 + $0x168] sm:$0xff]   ;;  %v1881_v57 = vld [vmem:[%s2411_s3 + $0x170] sm:$0xff]  }
 0x10d   :  { %1633 = vmatpush3.bf16.msra.mxu0 %v1853_v59  ;;  %v262_v61 = vpop.f32.mrb[12].mxu0 }
 0x10e   :  { %v1582_v63 = vpop.f32.mrb[13].mxu0  ;;  %1634 = vmatprep.subr.bf16.mxu0 %v1911_v0  ;;  %v315_v2 = vadd.f32 %v2093_v34, %v262_v61 }
 0x10f   :  { %v265_v1 = vpop.f32.mrb[14].mxu0 }
 0x110   :  { %v316_v3 = vadd.f32 %v2093_v34, %v265_v1  ;;  %v1583_v4 = vpop.f32.mrb[15].mxu0  ;;  %v1877_v1 = vld [vmem:[%s2411_s3 + $0x150] sm:$0xff]  }
 0x111   :  { %1635 = vmatpush3.bf16.msra.mxu0 %v1855_v62  ;;  %v1883_v4 = vld [vmem:[%s2411_s3 + $0x180] sm:$0xff]  }
 0x112   :  { %v687_v7 = vpack.c.bf16 %v316_v3, %v315_v2  ;;  %1636 = vmatprep.subr.bf16.mxu0 %v1911_v0  ;;  %v1879_v3 = vld [vmem:[%s2411_s3 + $0x160] sm:$0xff]  }
 0x114   :  { %1681 = vmatmul.mubr.bf16.vlgmr.msra.gmra.mrb[0].mxu1 %v687_v7  ;;  %v1886_v7 = vld [vmem:[%s2411_s3 + $0x198] sm:$0xff]  }
 0x115   :  { %1637 = vmatpush3.bf16.msra.mxu0 %v1857_v5  ;;  %1685 = vmatpush3.bf16.msra.mxu1 %v1858_v6  ;;  %v270_v10 = vpop.f32.mrb[16].mxu0  ;;  %v1884_v5 = vld [vmem:[%s2411_s3 + $0x188] sm:$0xff]   ;;  %v1885_v6 = vld [vmem:[%s2411_s3 + $0x190] sm:$0xff]  }
 0x116   :  { %1638 = vmatprep.subr.bf16.mxu0 %v1911_v0  ;;  %1686 = vmatprep.subr.bf16.mxu1 %v1911_v0  ;;  %v2150_v11 = vadd.f32 %v2093_v34, %v270_v10  ;;  %v1586_v12 = vpop.f32.mrb[17].mxu0  ;;  %v1889_v10 = vld [vmem:[%s2411_s3 + $0x1b0] sm:$0xff]  }
 0x117   :  { %v273_v13 = vpop.f32.mrb[18].mxu0  ;;  %1700 = vmatprep.mubr.msk.bf16.mxu1 %vm1912_vm0, %v1911_v0  ;;  %v1891_v12 = vld [vmem:[%s2411_s3 + $0x1c0] sm:$0xff]  }
 0x118   :  { %v2155_v14 = vadd.f32 %v2093_v34, %v273_v13  ;;  %v1587_v15 = vpop.f32.mrb[19].mxu0  ;;  %v1892_v13 = vld [vmem:[%s2411_s3 + $0x1c8] sm:$0xff]  }
 0x119   :  { %1639 = vmatpush3.bf16.msra.mxu0 %v1859_v8  ;;  %1687 = vmatpush3.bf16.msra.mxu1 %v1860_v9  ;;  %v1887_v8 = vld [vmem:[%s2411_s3 + $0x1a0] sm:$0xff]   ;;  %v1888_v9 = vld [vmem:[%s2411_s3 + $0x1a8] sm:$0xff]   ;;  %v1894_v15 = vld [vmem:[%s2411_s3 + $0x1d8] sm:$0xff]  }
 0x11a   :  { %1644 = vmatprep.subr.bf16.mxu0 %v1911_v0  ;;  %1688 = vmatprep.subr.bf16.mxu1 %v1911_v0  ;;  %v797_v18 = vpack.c.bf16 %v2155_v14, %v2150_v11  ;;  %v1890_v11 = vld [vmem:[%s2411_s3 + $0x1b8] sm:$0xff]   ;;  %v1893_v14 = vld [vmem:[%s2411_s3 + $0x1d0] sm:$0xff]  }
 0x11c   :  { %1641 = vmatmul.mubr.bf16.vlgmr.msra.gmra.mrb[36].mxu0 %v467_v51  ;;  %v1874_v51 = vld [vmem:[%s2411_s3 + $0x140] sm:$0xff]  }
 0x11d   :  { %1645 = vmatpush3.bf16.msra.mxu0 %v1861_v16  ;;  %1689 = vmatpush3.bf16.msra.mxu1 %v1862_v17  ;;  %v278_v21 = vpop.f32.mrb[20].mxu0  ;;  %v1895_v16 = vld [vmem:[%s2411_s3 + $0x1e0] sm:$0xff]   ;;  %v1896_v17 = vld [vmem:[%s2411_s3 + $0x1e8] sm:$0xff]  }
 0x11e   :  { %1646 = vmatprep.subr.bf16.mxu0 %v1911_v0  ;;  %1690 = vmatprep.subr.bf16.mxu1 %v1911_v0  ;;  %v2176_v22 = vadd.f32 %v2093_v34, %v278_v21  ;;  %v1590_v23 = vpop.f32.mrb[21].mxu0  ;;  %v1900_v21 = vld [vmem:[%s2411_s3 + $0x208] sm:$0xff]  }
 0x11f   :  { %1660 = vmatprep.mubr.msk.bf16.mxu0 %vm1912_vm0, %v1911_v0  ;;  %v281_v24 = vpop.f32.mrb[22].mxu0  ;;  %v1902_v23 = vld [vmem:[%s2411_s3 + $0x218] sm:$0xff]  }
 0x120   :  { %v2181_v25 = vadd.f32 %v2093_v34, %v281_v24  ;;  %v1591_v26 = vpop.f32.mrb[23].mxu0  ;;  %v1903_v24 = vld [vmem:[%s2411_s3 + $0x220] sm:$0xff]  }
 0x121   :  { %1647 = vmatpush3.bf16.msra.mxu0 %v1863_v19  ;;  %1691 = vmatpush3.bf16.msra.mxu1 %v1864_v20  ;;  %v1898_v19 = vld [vmem:[%s2411_s3 + $0x1f8] sm:$0xff]   ;;  %v1899_v20 = vld [vmem:[%s2411_s3 + $0x200] sm:$0xff]   ;;  %v1905_v26 = vld [vmem:[%s2411_s3 + $0x230] sm:$0xff]  }
 0x122   :  { %1648 = vmatprep.subr.bf16.mxu0 %v1911_v0  ;;  %1692 = vmatprep.subr.bf16.mxu1 %v1911_v0  ;;  %v907_v29 = vpack.c.bf16 %v2181_v25, %v2176_v22  ;;  %v1901_v22 = vld [vmem:[%s2411_s3 + $0x210] sm:$0xff]   ;;  %v1904_v25 = vld [vmem:[%s2411_s3 + $0x228] sm:$0xff]  }
 0x125   :  { %1649 = vmatpush3.bf16.msra.mxu0 %v1865_v27  ;;  %1693 = vmatpush3.bf16.msra.mxu1 %v1866_v28  ;;  %v286_v32 = vpop.f32.mrb[24].mxu0  ;;  %v1906_v27 = vld [vmem:[%s2411_s3 + $0x238] sm:$0xff]  }
 0x126   :  { %1650 = vmatprep.subr.bf16.mxu0 %v1911_v0  ;;  %1694 = vmatprep.subr.bf16.mxu1 %v1911_v0  ;;  %v2202_v33 = vadd.f32 %v2093_v34, %v286_v32  ;;  %v1594_v35 = vpop.f32.mrb[25].mxu0  ;;  %v1381_v32 = vld [vmem:[%s2413_s4] ss:$0 sm:$0xff] }
 0x127   :  { %v289_v36 = vpop.f32.mrb[26].mxu0 }
 0x128   :  { %v2205_v37 = vadd.f32 %v2093_v34, %v289_v36  ;;  %v1595_v38 = vpop.f32.mrb[27].mxu0 }
 0x129   :  { %1651 = vmatpush3.bf16.msra.mxu0 %v1867_v30  ;;  %1695 = vmatpush3.bf16.msra.mxu1 %v1868_v31 }
 0x12a   :  { %1652 = vmatprep.subr.bf16.mxu0 %v1911_v0  ;;  %1696 = vmatprep.subr.bf16.mxu1 %v1911_v0  ;;  %v1017_v41 = vpack.c.bf16 %v2205_v37, %v2202_v33 }
 0x12d   :  { %1653 = vmatpush3.bf16.msra.mxu0 %v1869_v39  ;;  %1697 = vmatpush3.bf16.msra.mxu1 %v1870_v40  ;;  %v294_v44 = vpop.f32.mrb[28].mxu0 }
 0x12e   :  { %1654 = vmatprep.subr.bf16.mxu0 %v1911_v0  ;;  %1698 = vmatprep.subr.bf16.mxu1 %v1911_v0  ;;  %v2226_v45 = vadd.f32 %v2093_v34, %v294_v44  ;;  %v1598_v46 = vpop.f32.mrb[29].mxu0 }
 0x12f   :  { %v297_v47 = vpop.f32.mrb[30].mxu0 }
 0x130   :  { %v2229_v48 = vadd.f32 %v2093_v34, %v297_v47  ;;  %v1599_v49 = vpop.f32.mrb[31].mxu0 }
 0x131   :  { %1655 = vmatpush3.bf16.msra.mxu0 %v1871_v42  ;;  %1699 = vmatpush3.bf16.msra.mxu1 %v1872_v43 }
 0x132   :  { %1656 = vmatprep.subr.bf16.mxu0 %v1911_v0  ;;  %1704 = vmatprep.subr.bf16.mxu1 %v1911_v0  ;;  %v1127_v52 = vpack.c.bf16 %v2229_v48, %v2226_v45 }
 0x134   :  { %1701 = vmatmul.mubr.bf16.vlgmr.msra.gmra.mrb[0].mxu1 %v797_v18  ;;  %v1897_v18 = vld [vmem:[%s2411_s3 + $0x1f0] sm:$0xff]  }
 0x135   :  { %1657 = vmatpush3.bf16.msra.mxu0 %v1873_v50  ;;  %1705 = vmatpush3.bf16.msra.mxu1 %v1874_v51  ;;  %v302_v55 = vpop.f32.mrb[32].mxu0 }
 0x136   :  { %1658 = vmatprep.subr.bf16.mxu0 %v1911_v0  ;;  %1706 = vmatprep.subr.bf16.mxu1 %v1911_v0  ;;  %v2250_v58 = vadd.f32 %v2093_v34, %v302_v55  ;;  %v1602_v59 = vpop.f32.mrb[33].mxu0 }
 0x137   :  { %1720 = vmatprep.mubr.msk.bf16.mxu1 %vm1912_vm0, %v1911_v0  ;;  %v305_v61 = vpop.f32.mrb[34].mxu0 }
 0x138   :  { %v2255_v62 = vadd.f32 %v2093_v34, %v305_v61  ;;  %v1603_v63 = vpop.f32.mrb[35].mxu0  ;;  %v1878_v34 = vld [vmem:[%s2411_s3 + $0x158] sm:$0xff]  }
 0x139   :  { %1659 = vmatpush3.bf16.msra.mxu0 %v1875_v53  ;;  %1707 = vmatpush3.bf16.msra.mxu1 %v1876_v54 }
 0x13a   :  { %1708 = vmatprep.subr.bf16.mxu1 %v1911_v0  ;;  %v1237_v2 = vpack.c.bf16 %v2255_v62, %v2250_v58 }
 0x13c   :  { %1661 = vmatmul.mubr.bf16.vlgmr.msra.gmra.mrb[36].mxu0 %v577_v60  ;;  %v1882_v60 = vld [vmem:[%s2411_s3 + $0x178] sm:$0xff]  }
 0x13d   :  { %1709 = vmatpush3.bf16.msra.mxu1 %v1877_v1 }
 0x13e   :  { %1710 = vmatprep.subr.bf16.mxu1 %v1911_v0 }
 0x141   :  { %1711 = vmatpush3.bf16.msra.mxu1 %v1878_v34 }
 0x142   :  { %1712 = vmatprep.subr.bf16.mxu1 %v1911_v0 }
 0x145   :  { %1713 = vmatpush3.bf16.msra.mxu1 %v1879_v3 }
 0x146   :  { %1714 = vmatprep.subr.bf16.mxu1 %v1911_v0 }
 0x149   :  { %1715 = vmatpush3.bf16.msra.mxu1 %v1880_v56 }
 0x14a   :  { %1716 = vmatprep.subr.bf16.mxu1 %v1911_v0 }
 0x14d   :  { %1717 = vmatpush3.bf16.msra.mxu1 %v1881_v57 }
 0x14e   :  { %1718 = vmatprep.subr.bf16.mxu1 %v1911_v0 }
 0x151   :  { %1719 = vmatpush3.bf16.msra.mxu1 %v1882_v60 }
 0x152   :  { %1724 = vmatprep.subr.bf16.mxu1 %v1911_v0 }
 0x154   :  { %1721 = vmatmul.mubr.bf16.vlgmr.msra.gmra.mrb[0].mxu1 %v907_v29 }
 0x155   :  { %1725 = vmatpush3.bf16.msra.mxu1 %v1883_v4  ;;  %1740 = vmatprep.mubr.msk.bf16.mxu1 %vm1912_vm0, %v1911_v0 }
 0x156   :  { %1726 = vmatprep.subr.bf16.mxu1 %v1911_v0 }
 0x159   :  { %1727 = vmatpush3.bf16.msra.mxu1 %v1884_v5 }
 0x15a   :  { %1728 = vmatprep.subr.bf16.mxu1 %v1911_v0 }
 0x15d   :  { %1729 = vmatpush3.bf16.msra.mxu1 %v1885_v6 }
 0x15e   :  { %1730 = vmatprep.subr.bf16.mxu1 %v1911_v0 }
 0x161   :  { %1731 = vmatpush3.bf16.msra.mxu1 %v1886_v7 }
 0x162   :  { %1732 = vmatprep.subr.bf16.mxu1 %v1911_v0 }
 0x165   :  { %1733 = vmatpush3.bf16.msra.mxu1 %v1887_v8 }
 0x166   :  { %1734 = vmatprep.subr.bf16.mxu1 %v1911_v0 }
 0x169   :  { %1735 = vmatpush3.bf16.msra.mxu1 %v1888_v9 }
 0x16a   :  { %1736 = vmatprep.subr.bf16.mxu1 %v1911_v0 }
 0x16d   :  { %1737 = vmatpush3.bf16.msra.mxu1 %v1889_v10 }
 0x16e   :  { %1738 = vmatprep.subr.bf16.mxu1 %v1911_v0 }
 0x171   :  { %1739 = vmatpush3.bf16.msra.mxu1 %v1890_v11 }
 0x172   :  { %1744 = vmatprep.subr.bf16.mxu1 %v1911_v0 }
 0x174   :  { %1741 = vmatmul.mubr.bf16.vlgmr.msra.gmra.mrb[0].mxu1 %v1017_v41 }
 0x175   :  { %1745 = vmatpush3.bf16.msra.mxu1 %v1891_v12  ;;  %1760 = vmatprep.mubr.msk.bf16.mxu1 %vm1912_vm0, %v1911_v0 }
 0x176   :  { %1746 = vmatprep.subr.bf16.mxu1 %v1911_v0 }
 0x179   :  { %1747 = vmatpush3.bf16.msra.mxu1 %v1892_v13 }
 0x17a   :  { %1748 = vmatprep.subr.bf16.mxu1 %v1911_v0 }
 0x17d   :  { %1749 = vmatpush3.bf16.msra.mxu1 %v1893_v14 }
 0x17e   :  { %1750 = vmatprep.subr.bf16.mxu1 %v1911_v0 }
 0x181   :  { %1751 = vmatpush3.bf16.msra.mxu1 %v1894_v15 }
 0x182   :  { %1752 = vmatprep.subr.bf16.mxu1 %v1911_v0 }
 0x185   :  { %1753 = vmatpush3.bf16.msra.mxu1 %v1895_v16 }
 0x186   :  { %1754 = vmatprep.subr.bf16.mxu1 %v1911_v0 }
 0x189   :  { %1755 = vmatpush3.bf16.msra.mxu1 %v1896_v17 }
 0x18a   :  { %1756 = vmatprep.subr.bf16.mxu1 %v1911_v0 }
 0x18d   :  { %1757 = vmatpush3.bf16.msra.mxu1 %v1897_v18 }
 0x18e   :  { %1758 = vmatprep.subr.bf16.mxu1 %v1911_v0 }
 0x191   :  { %1759 = vmatpush3.bf16.msra.mxu1 %v1898_v19 }
 0x192   :  { %1764 = vmatprep.subr.bf16.mxu1 %v1911_v0 }
 0x194   :  { %1761 = vmatmul.mubr.bf16.vlgmr.msra.gmra.mrb[0].mxu1 %v1127_v52 }
 0x195   :  { %1765 = vmatpush3.bf16.msra.mxu1 %v1899_v20  ;;  %1780 = vmatprep.mubr.msk.bf16.mxu1 %vm1912_vm0, %v1911_v0 }
 0x196   :  { %1766 = vmatprep.subr.bf16.mxu1 %v1911_v0 }
 0x199   :  { %1767 = vmatpush3.bf16.msra.mxu1 %v1900_v21 }
 0x19a   :  { %1768 = vmatprep.subr.bf16.mxu1 %v1911_v0 }
 0x19d   :  { %1769 = vmatpush3.bf16.msra.mxu1 %v1901_v22 }
 0x19e   :  { %1770 = vmatprep.subr.bf16.mxu1 %v1911_v0 }
 0x1a1   :  { %1771 = vmatpush3.bf16.msra.mxu1 %v1902_v23 }
 0x1a2   :  { %1772 = vmatprep.subr.bf16.mxu1 %v1911_v0 }
 0x1a5   :  { %1773 = vmatpush3.bf16.msra.mxu1 %v1903_v24 }
 0x1a6   :  { %1774 = vmatprep.subr.bf16.mxu1 %v1911_v0 }
 0x1a9   :  { %1775 = vmatpush3.bf16.msra.mxu1 %v1904_v25 }
 0x1aa   :  { %1776 = vmatprep.subr.bf16.mxu1 %v1911_v0 }
 0x1ad   :  { %1777 = vmatpush3.bf16.msra.mxu1 %v1905_v26 }
 0x1ae   :  { %1778 = vmatprep.subr.bf16.mxu1 %v1911_v0 }
 0x1b1   :  { %1779 = vmatpush3.bf16.msra.mxu1 %v1906_v27 }
 0x1b4   :  { %1781 = vmatmul.mubr.bf16.vlgmr.msra.gmra.mrb[0].mxu1 %v1237_v2 }
 0x20f   :  { %v676_v28 = vpop.f32.mrb[36].mxu0 }
 0x210   :  { %v1662_v29 = vpop.f32.mrb[37].mxu0  ;;  %v1784_v33 = vadd.f32 %v1381_v32, %v676_v28 }
 0x211   :  { %v679_v30 = vpop.f32.mrb[38].mxu0 }
 0x212   :  { %v1663_v31 = vpop.f32.mrb[39].mxu0  ;;  %v1786_v36 = vadd.f32 %v1381_v32, %v679_v30 }
 0x287   :  { %v1336_v35 = vpop.f32.mrb[0].mxu1 }
 0x288   :  { %v1785_v37 = vadd.f32 %v1784_v33, %v1336_v35  ;;  %v1782_v38 = vpop.f32.mrb[1].mxu1 }
 0x289   :  { %v1339_v39 = vpop.f32.mrb[2].mxu1 }
 0x28a   :  { %v1787_v0 = vadd.f32 %v1786_v36, %v1339_v39  ;;  %v1783_v40 = vpop.f32.mrb[3].mxu1  ;;  %v1345_v41 = vmul.f32 %v1785_v37, %v1785_v37 }
 0x28c   :  { %1347 = vadd.xlane.f32.xlu0 %v1345_v41  ;;  %v1346_v42 = vmul.f32 %v1787_v0, %v1787_v0 }
 0x290   :  { %1349 = vadd.xlane.f32.xlu0 %v1346_v42 }
 0x319   :  { %v1348_v43 = vpop.xlane.xlu0 %1347 }
 0x31a   :  { %v1351_v44 = vmax.f32 %v1348_v43, 1e-24 }
 0x31c   :  { %1907 = vrsqrt.f32 %v1351_v44 }
 0x31d   :  { %v1350_v45 = vpop.xlane.xlu0 %1349 }
 0x31e   :  { %v1352_v46 = vmax.f32 %v1350_v45, 1e-24 }
 0x320   :  { %1909 = vrsqrt.f32 %v1352_v46 }
 0x326   :  { %v1908_v47 = vpop.eup %1907 }
 0x327   :  { %v1355_v48 = vmul.f32 %v1908_v47, %v1785_v37 }
 0x329   :  { %1357 = vst [vmem:[%s2414_s5] sm:$0xff] %v1355_v48 }
 0x32a   :  { %v1910_v49 = vpop.eup %1909 }
 0x32b   :  { %v1356_v50 = vmul.f32 %v1910_v49, %v1787_v0 }
 0x32d   :  { %1358 = vst [vmem:[%s2414_s5 + $0x8] sm:$0xff] %v1356_v50 }

</bundles_post_ra>
